<compile_context>
chip_gen: v6e
topology: v6e:2x2x1
jax: 0.10.0
libtpu: 0.0.40
codegen_flags: <defaults>
</compile_context>

<pallas_src>
from typing import List, NamedTuple, Optional

import jax
import jax.numpy as jnp
from jax import lax
from jax.experimental import pallas as pl
from jax.experimental.pallas import tpu as pltpu


class TripletModelOutput(NamedTuple):
    user_embedding: jnp.ndarray
    positive_item_embedding: jnp.ndarray
    negative_item_embedding: Optional[jnp.ndarray]


# ----------------------------------------------------------------------------
# constants / helpers
# ----------------------------------------------------------------------------
_MAX_IDS_PER_CALL = 1 << 16      # keep scalar-prefetched ids well inside SMEM
_MAX_TILE_ROWS = 512             # rows gathered per grid step (amortize ~0.35us/step)
_TILE_VMEM_BYTES = 4 << 20       # cap one output block (it is double-buffered)
_DMA_WINDOW = 32                 # concurrent row DMAs in flight (large-table path)
_VMEM_HEADROOM = 8 << 20


def _round_up(x: int, m: int) -> int:
    return ((x + m - 1) // m) * m


def _vmem_capacity_bytes() -> int:
    try:
        cap = getattr(pltpu.get_tpu_info(), "vmem_capacity_bytes", None)
        if cap:
            return int(cap)
    except Exception:
        pass
    return 64 * 1024 * 1024  # conservative fallback (v7x per-TC VMEM)


# ----------------------------------------------------------------------------
# kernels
# ----------------------------------------------------------------------------
def _make_resident_gather_kernel(tile_rows: int, d: int, pack: int):
    """Fast path: whole table single-buffered in a persistent VMEM scratch."""
    unroll = 8 if pack <= 8 else 2

    def kernel(ids_ref, table_hbm, out_ref, table_vmem, load_sem):
        # One-time bulk HBM->VMEM table load.  The grid axis is "arbitrary"
        # (serial on one core), so step 0 always runs first and the scratch
        # persists across steps.
        @pl.when(pl.program_id(0) == 0)
        def _():
            cp = pltpu.make_async_copy(table_hbm, table_vmem, load_sem)
            cp.start()
            cp.wait()

        base = pl.program_id(0) * tile_rows

        def body(j, carry):
            row_base = base + j * pack
            # `pack` gathered rows are written lane-dense into one 128-lane
            # output row (the output block stays lane-dense for writeback).
            for r in range(pack):
                idx = ids_ref[row_base + r]
                out_ref[pl.ds(j, 1), pl.ds(r * d, d)] = table_vmem[pl.ds(idx, 1), :]
            return carry

        lax.fori_loop(0, tile_rows // pack, body, 0, unroll=unroll)

    return kernel


def _make_hbm_gather_kernel(tile_rows: int, window: int):
    """Large-table path: rows DMA'd from HBM straight into the output block
    with a rolling window of `window` concurrent DMAs (no staging buffer)."""

    def kernel(ids_ref, table_hbm, out_ref, sems):
        base = pl.program_id(0) * tile_rows

        def start_row(r):
            idx = ids_ref[base + r]
            pltpu.make_async_copy(
                table_hbm.at[idx], out_ref.at[r], sems.at[r % window]).start()

        def wait_row(r):
            # Src index 0 only fixes the transfer size for the wait; the id is
            # NOT re-read from SMEM here.
            pltpu.make_async_copy(
                table_hbm.at[0], out_ref.at[r], sems.at[r % window]).wait()

        # Prime `window` row DMAs.
        def prime(r, c):
            start_row(r)
            return c
        lax.fori_loop(0, window, prime, 0, unroll=True)

        # Rolling window: wait for row r, immediately start row r + window.
        if tile_rows > window:
            def body(r, c):
                wait_row(r)
                start_row(r + window)
                return c
            lax.fori_loop(0, tile_rows - window, body, 0, unroll=8)

        def drain(r, c):
            wait_row(r)
            return c
        lax.fori_loop(tile_rows - window, tile_rows, drain, 0, unroll=True)

    return kernel


# ----------------------------------------------------------------------------
# gather wrapper
# ----------------------------------------------------------------------------
def _gather_rows_chunk(table: jnp.ndarray, ids: jnp.ndarray, *,
                       force_dma: bool = False) -> jnp.ndarray:
    """out[i, :] = table[ids[i], :] via a single pallas_call."""
    V, D = table.shape
    N = int(ids.shape[0])
    dtype = table.dtype
    itemsize = jnp.dtype(dtype).itemsize
    ids = jnp.clip(ids.astype(jnp.int32), 0, V - 1)          # bounds safety

    # Lane-dense packing: `pack` gathered rows per 128-lane output row.
    pack = 128 // D if (D < 128 and 128 % D == 0) else 1
    base_tile = 8 * pack                                      # (8,128) block rule

    # Rows gathered per grid step: big (amortize per-step overhead) but capped
    # so a (double-buffered) output block stays within a few MiB of VMEM.
    per_row_worst = _round_up(D, 128) * itemsize
    rows_by_vmem = max(base_tile,
                       (_TILE_VMEM_BYTES // per_row_worst) // base_tile * base_tile)
    tile_rows = min(_round_up(max(N, 1), base_tile),
                    _round_up(_MAX_TILE_ROWS, base_tile),
                    rows_by_vmem)
    n_pad = _round_up(max(N, 1), tile_rows)
    if n_pad != N:
        ids = jnp.pad(ids, (0, n_pad - N))
    grid = (n_pad // tile_rows,)

    # ---- VMEM budget & cost model -------------------------------------
    vmem_cap = _vmem_capacity_bytes()
    budget = max(vmem_cap - _VMEM_HEADROOM, 16 << 20)
    table_vmem_bytes = _round_up(V, 8) * _round_up(D, 128) * itemsize   # 1 copy
    packed_block_bytes = (tile_rows // pack) * _round_up(pack * D, 128) * itemsize
    dma_block_bytes = tile_rows * _round_up(D, 128) * itemsize
    fast_needed = table_vmem_bytes + 2 * packed_block_bytes + (2 << 20)
    fits = fast_needed <= budget

    # Prefer the HBM path when preloading the whole table would move far more
    # HBM bytes than the gather itself (row DMAs < ~512B waste burst BW, so
    # weight the gather cost accordingly).
    table_hbm_bytes = V * D * itemsize
    gather_bytes = n_pad * D * itemsize
    dma_waste = max(1, 512 // max(D * itemsize, 1))
    prefer_vmem = table_hbm_bytes <= 4 * gather_bytes * dma_waste

    use_vmem_path = fits and prefer_vmem and (not force_dma)

    if use_vmem_path:
        out_rows, out_cols = n_pad // pack, pack * D
        out_shape = jax.ShapeDtypeStruct((out_rows, out_cols), dtype)
        out_spec = pl.BlockSpec((tile_rows // pack, out_cols),
                                lambda i, ids_ref: (i, 0))
        vmem_limit = int(min(budget, max(fast_needed + (4 << 20), 16 << 20)))
        fn = pl.pallas_call(
            _make_resident_gather_kernel(tile_rows, D, pack),
            out_shape=out_shape,
            grid_spec=pltpu.PrefetchScalarGridSpec(
                num_scalar_prefetch=1,                      # ids land in SMEM
                grid=grid,
                in_specs=[pl.BlockSpec(memory_space=pl.ANY)],   # table in HBM
                out_specs=out_spec,
                scratch_shapes=[
                    pltpu.VMEM((V, D), dtype),              # resident table (1x)
                    pltpu.SemaphoreType.DMA(()),
                ]),
            compiler_params=pltpu.CompilerParams(
                # "arbitrary": the step-0 table load must run on the same core
                # as every other step (also avoids per-TC table duplication).
                dimension_semantics=("arbitrary",),
                vmem_limit_bytes=vmem_limit),
        )
        packed = fn(ids, table)             # (n_pad // pack, pack * D) lane-dense
        return packed.reshape(n_pad, D)[:N]

    # ---- large-table path: per-row DMAs straight into the output block ----
    window = min(tile_rows, _DMA_WINDOW)
    out_shape = jax.ShapeDtypeStruct((n_pad, D), dtype)
    out_spec = pl.BlockSpec((tile_rows, D), lambda i, ids_ref: (i, 0))
    vmem_limit = int(min(budget, max(2 * dma_block_bytes + (4 << 20), 16 << 20)))
    fn = pl.pallas_call(
        _make_hbm_gather_kernel(tile_rows, window),
        out_shape=out_shape,
        grid_spec=pltpu.PrefetchScalarGridSpec(
            num_scalar_prefetch=1,
            grid=grid,
            in_specs=[pl.BlockSpec(memory_space=pl.ANY)],       # table stays in HBM
            out_specs=out_spec,
            scratch_shapes=[pltpu.SemaphoreType.DMA((window,))]),
        compiler_params=pltpu.CompilerParams(
            dimension_semantics=("parallel",),                  # no cross-step state
            vmem_limit_bytes=vmem_limit),
    )
    return fn(ids, table)[:N]


def _gather_rows(table: jnp.ndarray, ids: jnp.ndarray, *,
                 force_dma: bool = False) -> jnp.ndarray:
    N = int(ids.shape[0])
    if N <= _MAX_IDS_PER_CALL:
        return _gather_rows_chunk(table, ids, force_dma=force_dma)
    parts = [
        _gather_rows_chunk(table, ids[s:s + _MAX_IDS_PER_CALL], force_dma=force_dma)
        for s in range(0, N, _MAX_IDS_PER_CALL)
    ]
    return jnp.concatenate(parts, axis=0)


def fused_embedding_lookup(table: jnp.ndarray, ids_list: List[jnp.ndarray],
                           *, force_dma: bool = False) -> List[jnp.ndarray]:
    """Fuse several gathers from the same table into ONE pallas_call."""
    sizes = [int(x.shape[0]) for x in ids_list]
    ids = (jnp.concatenate([x.astype(jnp.int32) for x in ids_list])
           if len(ids_list) > 1 else ids_list[0].astype(jnp.int32))
    out = _gather_rows(table, ids, force_dma=force_dma)
    outs, off = [], 0
    for s in sizes:
        outs.append(out[off:off + s])
        off += s
    return outs


# ----------------------------------------------------------------------------
# MatrixFactorization model (JAX / Pallas)
# ----------------------------------------------------------------------------
class MatrixFactorization:
    def __init__(self, number_of_users: int, number_of_items: int,
                 embedding_dim: int, loss_function=None, *,
                 key: Optional[jax.Array] = None) -> None:
        if key is None:
            key = jax.random.PRNGKey(0)
        self.number_of_users = number_of_users
        self.number_of_items = number_of_items
        self.embedding_dim = embedding_dim
        self.loss_function = loss_function
        # torch: self.embedding_table.weight.data.uniform_(-0.05, 0.05)
        self.embedding_table = jax.random.uniform(
            key, (number_of_users + number_of_items, embedding_dim),
            minval=-0.05, maxval=0.05, dtype=jnp.float32)

    def get_user_embedding(self, user_ids: jnp.ndarray) -> jnp.ndarray:
        return fused_embedding_lookup(self.embedding_table, [user_ids])[0]

    def get_item_embedding(self, item_ids: jnp.ndarray) -> jnp.ndarray:
        return fused_embedding_lookup(self.embedding_table, [item_ids])[0]

    def forward(self, graph=None, user_ids: Optional[jnp.ndarray] = None,
                positive_item_ids: Optional[jnp.ndarray] = None,
                negative_item_ids: Optional[jnp.ndarray] = None,
                is_training: bool = False):
        del graph  # unused by the reference forward as well
        id_vectors = [user_ids, positive_item_ids]
        if negative_item_ids is not None:
            id_vectors.append(negative_item_ids)
        embs = fused_embedding_lookup(self.embedding_table, id_vectors)
        model_output = TripletModelOutput(
            user_embedding=embs[0],
            positive_item_embedding=embs[1],
            negative_item_embedding=embs[2] if negative_item_ids is not None else None,
        )
        if is_training and self.loss_function is not None:
            # TODO(synk): BaseLossFunction is external to this module; the loss
            # itself is not translated here.
            return model_output, self.loss_function.get_loss(model_output)
        return model_output

    def get_all_embbedings(self, **kwargs) -> jnp.ndarray:   # original spelling
        return self.embedding_table

    def get_all_embeddings(self) -> jnp.ndarray:
        return self.embedding_table


# ----------------------------------------------------------------------------
# self-test
# ----------------------------------------------------------------------------
if __name__ == "__main__":
    num_users, num_items, embedding_dim = 8, 16, 32
    batch = 8

    root = jax.random.PRNGKey(0)
    k_tab, k_u, k_p, k_n, k_t2, k_i2 = jax.random.split(root, 6)

    model = MatrixFactorization(num_users, num_items, embedding_dim,
                                loss_function=None, key=k_tab)

    # user ids index the first `num_users` rows; item ids the remaining rows
    user_ids = jax.random.randint(k_u, (batch,), 0, num_users, dtype=jnp.int32)
    pos_ids = jax.random.randint(k_p, (batch,), num_users,
                                 num_users + num_items, dtype=jnp.int32)
    neg_ids = jax.random.randint(k_n, (batch,), num_users,
                                 num_users + num_items, dtype=jnp.int32)

    out = model.forward(graph=None, user_ids=user_ids,
                        positive_item_ids=pos_ids, negative_item_ids=neg_ids)
    jax.block_until_ready(out.user_embedding)
    jax.block_until_ready(out.positive_item_embedding)
    jax.block_until_ready(out.negative_item_embedding)

    tab = model.get_all_embeddings()
    assert out.user_embedding.shape == (batch, embedding_dim)
    assert out.user_embedding.dtype == jnp.float32
    assert jnp.allclose(out.user_embedding, jnp.take(tab, user_ids, axis=0))
    assert jnp.allclose(out.positive_item_embedding, jnp.take(tab, pos_ids, axis=0))
    assert jnp.allclose(out.negative_item_embedding, jnp.take(tab, neg_ids, axis=0))

    # no-negatives path
    out2 = model.forward(user_ids=user_ids, positive_item_ids=pos_ids)
    jax.block_until_ready(out2.user_embedding)
    assert out2.negative_item_embedding is None
    assert jnp.allclose(out2.user_embedding, jnp.take(tab, user_ids, axis=0))

    # explicitly exercise the large-table (rolling-window HBM DMA) path
    all_ids = jnp.concatenate([user_ids, pos_ids, neg_ids])
    dma_out = _gather_rows(tab, all_ids, force_dma=True)
    jax.block_until_ready(dma_out)
    assert jnp.allclose(dma_out, jnp.take(tab, all_ids, axis=0))

    # exercise the pack == 1 (D >= 128) fast path
    tab128 = jax.random.uniform(k_t2, (16, 128), minval=-0.05, maxval=0.05,
                                dtype=jnp.float32)
    ids128 = jax.random.randint(k_i2, (batch,), 0, 16, dtype=jnp.int32)
    out128 = _gather_rows(tab128, ids128)
    jax.block_until_ready(out128)
    assert jnp.allclose(out128, jnp.take(tab128, ids128, axis=0))

    print("KERNEL_OK")
</pallas_src>

<mosaic_0001>
module attributes {stable_mosaic.version = 11 : i64} {
  func.func @kernel(%arg0: i32, %arg1: memref<32xi32, #tpu.memory_space<smem>>, %arg2: memref<24x32xf32, #tpu.memory_space<any>>, %arg3: memref<8x128xf32, #tpu.memory_space<vmem>>, %arg4: memref<24x32xf32, #tpu.memory_space<vmem>>, %arg5: memref<!tpu.dma_semaphore, #tpu.memory_space<semaphore_mem>>) attributes {dimension_semantics = [#tpu.dimension_semantics<arbitrary>], iteration_bounds = array<i64: 1>, scalar_prefetch = 1 : i64, scratch_operands = 2 : i64, tpu.core_type = #tpu.core_type<tc>, window_params = [{}, {transform_indices = @transform_1, window_bounds = array<i64: 8, 128>}]} {
    %c0_i32 = arith.constant 0 : i32
    %0 = arith.cmpi eq, %arg0, %c0_i32 : i32
    %1 = arith.extui %0 : i1 to i32
    %c0_i32_0 = arith.constant 0 : i32
    %2 = arith.cmpi ne, %1, %c0_i32_0 : i32
    scf.if %2 {
      tpu.enqueue_dma source(%arg2 : memref<24x32xf32, #tpu.memory_space<any>>) target(%arg4 : memref<24x32xf32, #tpu.memory_space<vmem>>) target_semaphore(%arg5 : memref<!tpu.dma_semaphore, #tpu.memory_space<semaphore_mem>>)
      tpu.wait_dma2 semaphore(%arg5 : memref<!tpu.dma_semaphore, #tpu.memory_space<semaphore_mem>>) src(%arg2 : memref<24x32xf32, #tpu.memory_space<any>>) dst(%arg4 : memref<24x32xf32, #tpu.memory_space<vmem>>)
    } else {
    }
    %c32_i32 = arith.constant 32 : i32
    %3 = arith.muli %arg0, %c32_i32 : i32
    %c0_i32_1 = arith.constant 0 : i32
    %c4_i32 = arith.constant 4 : i32
    %4 = arith.muli %c0_i32_1, %c4_i32 : i32
    %5 = arith.addi %3, %4 : i32
    %c0_i32_2 = arith.constant 0 : i32
    %6 = arith.addi %5, %c0_i32_2 : i32
    %7 = arith.index_cast %6 : i32 to index
    %8 = memref.load %arg1[%7] : memref<32xi32, #tpu.memory_space<smem>>
    %9 = arith.index_cast %8 : i32 to index
    %c0 = arith.constant 0 : index
    %10 = vector.load %arg4[%9, %c0] : memref<24x32xf32, #tpu.memory_space<vmem>>, vector<1x32xf32>
    %11 = arith.index_cast %c0_i32_1 : i32 to index
    %c0_3 = arith.constant 0 : index
    %12 = vector.load %arg3[%11, %c0_3] : memref<8x128xf32, #tpu.memory_space<vmem>>, vector<1x32xf32>
    tpu.vector_store %arg3[%11, %c0_3], %10 {strides = array<i32>} : memref<8x128xf32, #tpu.memory_space<vmem>>, vector<1x32xf32>,
    %c1_i32 = arith.constant 1 : i32
    %13 = arith.addi %5, %c1_i32 : i32
    %14 = arith.index_cast %13 : i32 to index
    %15 = memref.load %arg1[%14] : memref<32xi32, #tpu.memory_space<smem>>
    %16 = arith.index_cast %15 : i32 to index
    %c0_4 = arith.constant 0 : index
    %17 = vector.load %arg4[%16, %c0_4] : memref<24x32xf32, #tpu.memory_space<vmem>>, vector<1x32xf32>
    %18 = arith.index_cast %c0_i32_1 : i32 to index
    %c32 = arith.constant 32 : index
    %19 = vector.load %arg3[%18, %c32] : memref<8x128xf32, #tpu.memory_space<vmem>>, vector<1x32xf32>
    tpu.vector_store %arg3[%18, %c32], %17 {strides = array<i32>} : memref<8x128xf32, #tpu.memory_space<vmem>>, vector<1x32xf32>,
    %c2_i32 = arith.constant 2 : i32
    %20 = arith.addi %5, %c2_i32 : i32
    %21 = arith.index_cast %20 : i32 to index
    %22 = memref.load %arg1[%21] : memref<32xi32, #tpu.memory_space<smem>>
    %23 = arith.index_cast %22 : i32 to index
    %c0_5 = arith.constant 0 : index
    %24 = vector.load %arg4[%23, %c0_5] : memref<24x32xf32, #tpu.memory_space<vmem>>, vector<1x32xf32>
    %25 = arith.index_cast %c0_i32_1 : i32 to index
    %c64 = arith.constant 64 : index
    %26 = vector.load %arg3[%25, %c64] : memref<8x128xf32, #tpu.memory_space<vmem>>, vector<1x32xf32>
    tpu.vector_store %arg3[%25, %c64], %24 {strides = array<i32>} : memref<8x128xf32, #tpu.memory_space<vmem>>, vector<1x32xf32>,
    %c3_i32 = arith.constant 3 : i32
    %27 = arith.addi %5, %c3_i32 : i32
    %28 = arith.index_cast %27 : i32 to index
    %29 = memref.load %arg1[%28] : memref<32xi32, #tpu.memory_space<smem>>
    %30 = arith.index_cast %29 : i32 to index
    %c0_6 = arith.constant 0 : index
    %31 = vector.load %arg4[%30, %c0_6] : memref<24x32xf32, #tpu.memory_space<vmem>>, vector<1x32xf32>
    %32 = arith.index_cast %c0_i32_1 : i32 to index
    %c96 = arith.constant 96 : index
    %33 = vector.load %arg3[%32, %c96] : memref<8x128xf32, #tpu.memory_space<vmem>>, vector<1x32xf32>
    tpu.vector_store %arg3[%32, %c96], %31 {strides = array<i32>} : memref<8x128xf32, #tpu.memory_space<vmem>>, vector<1x32xf32>,
    %c1_i32_7 = arith.constant 1 : i32
    %c4_i32_8 = arith.constant 4 : i32
    %34 = arith.muli %c1_i32_7, %c4_i32_8 : i32
    %35 = arith.addi %3, %34 : i32
    %c0_i32_9 = arith.constant 0 : i32
    %36 = arith.addi %35, %c0_i32_9 : i32
    %37 = arith.index_cast %36 : i32 to index
    %38 = memref.load %arg1[%37] : memref<32xi32, #tpu.memory_space<smem>>
    %39 = arith.index_cast %38 : i32 to index
    %c0_10 = arith.constant 0 : index
    %40 = vector.load %arg4[%39, %c0_10] : memref<24x32xf32, #tpu.memory_space<vmem>>, vector<1x32xf32>
    %41 = arith.index_cast %c1_i32_7 : i32 to index
    %c0_11 = arith.constant 0 : index
    %42 = vector.load %arg3[%41, %c0_11] : memref<8x128xf32, #tpu.memory_space<vmem>>, vector<1x32xf32>
    tpu.vector_store %arg3[%41, %c0_11], %40 {strides = array<i32>} : memref<8x128xf32, #tpu.memory_space<vmem>>, vector<1x32xf32>,
    %c1_i32_12 = arith.constant 1 : i32
    %43 = arith.addi %35, %c1_i32_12 : i32
    %44 = arith.index_cast %43 : i32 to index
    %45 = memref.load %arg1[%44] : memref<32xi32, #tpu.memory_space<smem>>
    %46 = arith.index_cast %45 : i32 to index
    %c0_13 = arith.constant 0 : index
    %47 = vector.load %arg4[%46, %c0_13] : memref<24x32xf32, #tpu.memory_space<vmem>>, vector<1x32xf32>
    %48 = arith.index_cast %c1_i32_7 : i32 to index
    %c32_14 = arith.constant 32 : index
    %49 = vector.load %arg3[%48, %c32_14] : memref<8x128xf32, #tpu.memory_space<vmem>>, vector<1x32xf32>
    tpu.vector_store %arg3[%48, %c32_14], %47 {strides = array<i32>} : memref<8x128xf32, #tpu.memory_space<vmem>>, vector<1x32xf32>,
    %c2_i32_15 = arith.constant 2 : i32
    %50 = arith.addi %35, %c2_i32_15 : i32
    %51 = arith.index_cast %50 : i32 to index
    %52 = memref.load %arg1[%51] : memref<32xi32, #tpu.memory_space<smem>>
    %53 = arith.index_cast %52 : i32 to index
    %c0_16 = arith.constant 0 : index
    %54 = vector.load %arg4[%53, %c0_16] : memref<24x32xf32, #tpu.memory_space<vmem>>, vector<1x32xf32>
    %55 = arith.index_cast %c1_i32_7 : i32 to index
    %c64_17 = arith.constant 64 : index
    %56 = vector.load %arg3[%55, %c64_17] : memref<8x128xf32, #tpu.memory_space<vmem>>, vector<1x32xf32>
    tpu.vector_store %arg3[%55, %c64_17], %54 {strides = array<i32>} : memref<8x128xf32, #tpu.memory_space<vmem>>, vector<1x32xf32>,
    %c3_i32_18 = arith.constant 3 : i32
    %57 = arith.addi %35, %c3_i32_18 : i32
    %58 = arith.index_cast %57 : i32 to index
    %59 = memref.load %arg1[%58] : memref<32xi32, #tpu.memory_space<smem>>
    %60 = arith.index_cast %59 : i32 to index
    %c0_19 = arith.constant 0 : index
    %61 = vector.load %arg4[%60, %c0_19] : memref<24x32xf32, #tpu.memory_space<vmem>>, vector<1x32xf32>
    %62 = arith.index_cast %c1_i32_7 : i32 to index
    %c96_20 = arith.constant 96 : index
    %63 = vector.load %arg3[%62, %c96_20] : memref<8x128xf32, #tpu.memory_space<vmem>>, vector<1x32xf32>
    tpu.vector_store %arg3[%62, %c96_20], %61 {strides = array<i32>} : memref<8x128xf32, #tpu.memory_space<vmem>>, vector<1x32xf32>,
    %c2_i32_21 = arith.constant 2 : i32
    %c4_i32_22 = arith.constant 4 : i32
    %64 = arith.muli %c2_i32_21, %c4_i32_22 : i32
    %65 = arith.addi %3, %64 : i32
    %c0_i32_23 = arith.constant 0 : i32
    %66 = arith.addi %65, %c0_i32_23 : i32
    %67 = arith.index_cast %66 : i32 to index
    %68 = memref.load %arg1[%67] : memref<32xi32, #tpu.memory_space<smem>>
    %69 = arith.index_cast %68 : i32 to index
    %c0_24 = arith.constant 0 : index
    %70 = vector.load %arg4[%69, %c0_24] : memref<24x32xf32, #tpu.memory_space<vmem>>, vector<1x32xf32>
    %71 = arith.index_cast %c2_i32_21 : i32 to index
    %c0_25 = arith.constant 0 : index
    %72 = vector.load %arg3[%71, %c0_25] : memref<8x128xf32, #tpu.memory_space<vmem>>, vector<1x32xf32>
    tpu.vector_store %arg3[%71, %c0_25], %70 {strides = array<i32>} : memref<8x128xf32, #tpu.memory_space<vmem>>, vector<1x32xf32>,
    %c1_i32_26 = arith.constant 1 : i32
    %73 = arith.addi %65, %c1_i32_26 : i32
    %74 = arith.index_cast %73 : i32 to index
    %75 = memref.load %arg1[%74] : memref<32xi32, #tpu.memory_space<smem>>
    %76 = arith.index_cast %75 : i32 to index
    %c0_27 = arith.constant 0 : index
    %77 = vector.load %arg4[%76, %c0_27] : memref<24x32xf32, #tpu.memory_space<vmem>>, vector<1x32xf32>
    %78 = arith.index_cast %c2_i32_21 : i32 to index
    %c32_28 = arith.constant 32 : index
    %79 = vector.load %arg3[%78, %c32_28] : memref<8x128xf32, #tpu.memory_space<vmem>>, vector<1x32xf32>
    tpu.vector_store %arg3[%78, %c32_28], %77 {strides = array<i32>} : memref<8x128xf32, #tpu.memory_space<vmem>>, vector<1x32xf32>,
    %c2_i32_29 = arith.constant 2 : i32
    %80 = arith.addi %65, %c2_i32_29 : i32
    %81 = arith.index_cast %80 : i32 to index
    %82 = memref.load %arg1[%81] : memref<32xi32, #tpu.memory_space<smem>>
    %83 = arith.index_cast %82 : i32 to index
    %c0_30 = arith.constant 0 : index
    %84 = vector.load %arg4[%83, %c0_30] : memref<24x32xf32, #tpu.memory_space<vmem>>, vector<1x32xf32>
    %85 = arith.index_cast %c2_i32_21 : i32 to index
    %c64_31 = arith.constant 64 : index
    %86 = vector.load %arg3[%85, %c64_31] : memref<8x128xf32, #tpu.memory_space<vmem>>, vector<1x32xf32>
    tpu.vector_store %arg3[%85, %c64_31], %84 {strides = array<i32>} : memref<8x128xf32, #tpu.memory_space<vmem>>, vector<1x32xf32>,
    %c3_i32_32 = arith.constant 3 : i32
    %87 = arith.addi %65, %c3_i32_32 : i32
    %88 = arith.index_cast %87 : i32 to index
    %89 = memref.load %arg1[%88] : memref<32xi32, #tpu.memory_space<smem>>
    %90 = arith.index_cast %89 : i32 to index
    %c0_33 = arith.constant 0 : index
    %91 = vector.load %arg4[%90, %c0_33] : memref<24x32xf32, #tpu.memory_space<vmem>>, vector<1x32xf32>
    %92 = arith.index_cast %c2_i32_21 : i32 to index
    %c96_34 = arith.constant 96 : index
    %93 = vector.load %arg3[%92, %c96_34] : memref<8x128xf32, #tpu.memory_space<vmem>>, vector<1x32xf32>
    tpu.vector_store %arg3[%92, %c96_34], %91 {strides = array<i32>} : memref<8x128xf32, #tpu.memory_space<vmem>>, vector<1x32xf32>,
    %c3_i32_35 = arith.constant 3 : i32
    %c4_i32_36 = arith.constant 4 : i32
    %94 = arith.muli %c3_i32_35, %c4_i32_36 : i32
    %95 = arith.addi %3, %94 : i32
    %c0_i32_37 = arith.constant 0 : i32
    %96 = arith.addi %95, %c0_i32_37 : i32
    %97 = arith.index_cast %96 : i32 to index
    %98 = memref.load %arg1[%97] : memref<32xi32, #tpu.memory_space<smem>>
    %99 = arith.index_cast %98 : i32 to index
    %c0_38 = arith.constant 0 : index
    %100 = vector.load %arg4[%99, %c0_38] : memref<24x32xf32, #tpu.memory_space<vmem>>, vector<1x32xf32>
    %101 = arith.index_cast %c3_i32_35 : i32 to index
    %c0_39 = arith.constant 0 : index
    %102 = vector.load %arg3[%101, %c0_39] : memref<8x128xf32, #tpu.memory_space<vmem>>, vector<1x32xf32>
    tpu.vector_store %arg3[%101, %c0_39], %100 {strides = array<i32>} : memref<8x128xf32, #tpu.memory_space<vmem>>, vector<1x32xf32>,
    %c1_i32_40 = arith.constant 1 : i32
    %103 = arith.addi %95, %c1_i32_40 : i32
    %104 = arith.index_cast %103 : i32 to index
    %105 = memref.load %arg1[%104] : memref<32xi32, #tpu.memory_space<smem>>
    %106 = arith.index_cast %105 : i32 to index
    %c0_41 = arith.constant 0 : index
    %107 = vector.load %arg4[%106, %c0_41] : memref<24x32xf32, #tpu.memory_space<vmem>>, vector<1x32xf32>
    %108 = arith.index_cast %c3_i32_35 : i32 to index
    %c32_42 = arith.constant 32 : index
    %109 = vector.load %arg3[%108, %c32_42] : memref<8x128xf32, #tpu.memory_space<vmem>>, vector<1x32xf32>
    tpu.vector_store %arg3[%108, %c32_42], %107 {strides = array<i32>} : memref<8x128xf32, #tpu.memory_space<vmem>>, vector<1x32xf32>,
    %c2_i32_43 = arith.constant 2 : i32
    %110 = arith.addi %95, %c2_i32_43 : i32
    %111 = arith.index_cast %110 : i32 to index
    %112 = memref.load %arg1[%111] : memref<32xi32, #tpu.memory_space<smem>>
    %113 = arith.index_cast %112 : i32 to index
    %c0_44 = arith.constant 0 : index
    %114 = vector.load %arg4[%113, %c0_44] : memref<24x32xf32, #tpu.memory_space<vmem>>, vector<1x32xf32>
    %115 = arith.index_cast %c3_i32_35 : i32 to index
    %c64_45 = arith.constant 64 : index
    %116 = vector.load %arg3[%115, %c64_45] : memref<8x128xf32, #tpu.memory_space<vmem>>, vector<1x32xf32>
    tpu.vector_store %arg3[%115, %c64_45], %114 {strides = array<i32>} : memref<8x128xf32, #tpu.memory_space<vmem>>, vector<1x32xf32>,
    %c3_i32_46 = arith.constant 3 : i32
    %117 = arith.addi %95, %c3_i32_46 : i32
    %118 = arith.index_cast %117 : i32 to index
    %119 = memref.load %arg1[%118] : memref<32xi32, #tpu.memory_space<smem>>
    %120 = arith.index_cast %119 : i32 to index
    %c0_47 = arith.constant 0 : index
    %121 = vector.load %arg4[%120, %c0_47] : memref<24x32xf32, #tpu.memory_space<vmem>>, vector<1x32xf32>
    %122 = arith.index_cast %c3_i32_35 : i32 to index
    %c96_48 = arith.constant 96 : index
    %123 = vector.load %arg3[%122, %c96_48] : memref<8x128xf32, #tpu.memory_space<vmem>>, vector<1x32xf32>
    tpu.vector_store %arg3[%122, %c96_48], %121 {strides = array<i32>} : memref<8x128xf32, #tpu.memory_space<vmem>>, vector<1x32xf32>,
    %c4_i32_49 = arith.constant 4 : i32
    %c4_i32_50 = arith.constant 4 : i32
    %124 = arith.muli %c4_i32_49, %c4_i32_50 : i32
    %125 = arith.addi %3, %124 : i32
    %c0_i32_51 = arith.constant 0 : i32
    %126 = arith.addi %125, %c0_i32_51 : i32
    %127 = arith.index_cast %126 : i32 to index
    %128 = memref.load %arg1[%127] : memref<32xi32, #tpu.memory_space<smem>>
    %129 = arith.index_cast %128 : i32 to index
    %c0_52 = arith.constant 0 : index
    %130 = vector.load %arg4[%129, %c0_52] : memref<24x32xf32, #tpu.memory_space<vmem>>, vector<1x32xf32>
    %131 = arith.index_cast %c4_i32_49 : i32 to index
    %c0_53 = arith.constant 0 : index
    %132 = vector.load %arg3[%131, %c0_53] : memref<8x128xf32, #tpu.memory_space<vmem>>, vector<1x32xf32>
    tpu.vector_store %arg3[%131, %c0_53], %130 {strides = array<i32>} : memref<8x128xf32, #tpu.memory_space<vmem>>, vector<1x32xf32>,
    %c1_i32_54 = arith.constant 1 : i32
    %133 = arith.addi %125, %c1_i32_54 : i32
    %134 = arith.index_cast %133 : i32 to index
    %135 = memref.load %arg1[%134] : memref<32xi32, #tpu.memory_space<smem>>
    %136 = arith.index_cast %135 : i32 to index
    %c0_55 = arith.constant 0 : index
    %137 = vector.load %arg4[%136, %c0_55] : memref<24x32xf32, #tpu.memory_space<vmem>>, vector<1x32xf32>
    %138 = arith.index_cast %c4_i32_49 : i32 to index
    %c32_56 = arith.constant 32 : index
    %139 = vector.load %arg3[%138, %c32_56] : memref<8x128xf32, #tpu.memory_space<vmem>>, vector<1x32xf32>
    tpu.vector_store %arg3[%138, %c32_56], %137 {strides = array<i32>} : memref<8x128xf32, #tpu.memory_space<vmem>>, vector<1x32xf32>,
    %c2_i32_57 = arith.constant 2 : i32
    %140 = arith.addi %125, %c2_i32_57 : i32
    %141 = arith.index_cast %140 : i32 to index
    %142 = memref.load %arg1[%141] : memref<32xi32, #tpu.memory_space<smem>>
    %143 = arith.index_cast %142 : i32 to index
    %c0_58 = arith.constant 0 : index
    %144 = vector.load %arg4[%143, %c0_58] : memref<24x32xf32, #tpu.memory_space<vmem>>, vector<1x32xf32>
    %145 = arith.index_cast %c4_i32_49 : i32 to index
    %c64_59 = arith.constant 64 : index
    %146 = vector.load %arg3[%145, %c64_59] : memref<8x128xf32, #tpu.memory_space<vmem>>, vector<1x32xf32>
    tpu.vector_store %arg3[%145, %c64_59], %144 {strides = array<i32>} : memref<8x128xf32, #tpu.memory_space<vmem>>, vector<1x32xf32>,
    %c3_i32_60 = arith.constant 3 : i32
    %147 = arith.addi %125, %c3_i32_60 : i32
    %148 = arith.index_cast %147 : i32 to index
    %149 = memref.load %arg1[%148] : memref<32xi32, #tpu.memory_space<smem>>
    %150 = arith.index_cast %149 : i32 to index
    %c0_61 = arith.constant 0 : index
    %151 = vector.load %arg4[%150, %c0_61] : memref<24x32xf32, #tpu.memory_space<vmem>>, vector<1x32xf32>
    %152 = arith.index_cast %c4_i32_49 : i32 to index
    %c96_62 = arith.constant 96 : index
    %153 = vector.load %arg3[%152, %c96_62] : memref<8x128xf32, #tpu.memory_space<vmem>>, vector<1x32xf32>
    tpu.vector_store %arg3[%152, %c96_62], %151 {strides = array<i32>} : memref<8x128xf32, #tpu.memory_space<vmem>>, vector<1x32xf32>,
    %c5_i32 = arith.constant 5 : i32
    %c4_i32_63 = arith.constant 4 : i32
    %154 = arith.muli %c5_i32, %c4_i32_63 : i32
    %155 = arith.addi %3, %154 : i32
    %c0_i32_64 = arith.constant 0 : i32
    %156 = arith.addi %155, %c0_i32_64 : i32
    %157 = arith.index_cast %156 : i32 to index
    %158 = memref.load %arg1[%157] : memref<32xi32, #tpu.memory_space<smem>>
    %159 = arith.index_cast %158 : i32 to index
    %c0_65 = arith.constant 0 : index
    %160 = vector.load %arg4[%159, %c0_65] : memref<24x32xf32, #tpu.memory_space<vmem>>, vector<1x32xf32>
    %161 = arith.index_cast %c5_i32 : i32 to index
    %c0_66 = arith.constant 0 : index
    %162 = vector.load %arg3[%161, %c0_66] : memref<8x128xf32, #tpu.memory_space<vmem>>, vector<1x32xf32>
    tpu.vector_store %arg3[%161, %c0_66], %160 {strides = array<i32>} : memref<8x128xf32, #tpu.memory_space<vmem>>, vector<1x32xf32>,
    %c1_i32_67 = arith.constant 1 : i32
    %163 = arith.addi %155, %c1_i32_67 : i32
    %164 = arith.index_cast %163 : i32 to index
    %165 = memref.load %arg1[%164] : memref<32xi32, #tpu.memory_space<smem>>
    %166 = arith.index_cast %165 : i32 to index
    %c0_68 = arith.constant 0 : index
    %167 = vector.load %arg4[%166, %c0_68] : memref<24x32xf32, #tpu.memory_space<vmem>>, vector<1x32xf32>
    %168 = arith.index_cast %c5_i32 : i32 to index
    %c32_69 = arith.constant 32 : index
    %169 = vector.load %arg3[%168, %c32_69] : memref<8x128xf32, #tpu.memory_space<vmem>>, vector<1x32xf32>
    tpu.vector_store %arg3[%168, %c32_69], %167 {strides = array<i32>} : memref<8x128xf32, #tpu.memory_space<vmem>>, vector<1x32xf32>,
    %c2_i32_70 = arith.constant 2 : i32
    %170 = arith.addi %155, %c2_i32_70 : i32
    %171 = arith.index_cast %170 : i32 to index
    %172 = memref.load %arg1[%171] : memref<32xi32, #tpu.memory_space<smem>>
    %173 = arith.index_cast %172 : i32 to index
    %c0_71 = arith.constant 0 : index
    %174 = vector.load %arg4[%173, %c0_71] : memref<24x32xf32, #tpu.memory_space<vmem>>, vector<1x32xf32>
    %175 = arith.index_cast %c5_i32 : i32 to index
    %c64_72 = arith.constant 64 : index
    %176 = vector.load %arg3[%175, %c64_72] : memref<8x128xf32, #tpu.memory_space<vmem>>, vector<1x32xf32>
    tpu.vector_store %arg3[%175, %c64_72], %174 {strides = array<i32>} : memref<8x128xf32, #tpu.memory_space<vmem>>, vector<1x32xf32>,
    %c3_i32_73 = arith.constant 3 : i32
    %177 = arith.addi %155, %c3_i32_73 : i32
    %178 = arith.index_cast %177 : i32 to index
    %179 = memref.load %arg1[%178] : memref<32xi32, #tpu.memory_space<smem>>
    %180 = arith.index_cast %179 : i32 to index
    %c0_74 = arith.constant 0 : index
    %181 = vector.load %arg4[%180, %c0_74] : memref<24x32xf32, #tpu.memory_space<vmem>>, vector<1x32xf32>
    %182 = arith.index_cast %c5_i32 : i32 to index
    %c96_75 = arith.constant 96 : index
    %183 = vector.load %arg3[%182, %c96_75] : memref<8x128xf32, #tpu.memory_space<vmem>>, vector<1x32xf32>
    tpu.vector_store %arg3[%182, %c96_75], %181 {strides = array<i32>} : memref<8x128xf32, #tpu.memory_space<vmem>>, vector<1x32xf32>,
    %c6_i32 = arith.constant 6 : i32
    %c4_i32_76 = arith.constant 4 : i32
    %184 = arith.muli %c6_i32, %c4_i32_76 : i32
    %185 = arith.addi %3, %184 : i32
    %c0_i32_77 = arith.constant 0 : i32
    %186 = arith.addi %185, %c0_i32_77 : i32
    %187 = arith.index_cast %186 : i32 to index
    %188 = memref.load %arg1[%187] : memref<32xi32, #tpu.memory_space<smem>>
    %189 = arith.index_cast %188 : i32 to index
    %c0_78 = arith.constant 0 : index
    %190 = vector.load %arg4[%189, %c0_78] : memref<24x32xf32, #tpu.memory_space<vmem>>, vector<1x32xf32>
    %191 = arith.index_cast %c6_i32 : i32 to index
    %c0_79 = arith.constant 0 : index
    %192 = vector.load %arg3[%191, %c0_79] : memref<8x128xf32, #tpu.memory_space<vmem>>, vector<1x32xf32>
    tpu.vector_store %arg3[%191, %c0_79], %190 {strides = array<i32>} : memref<8x128xf32, #tpu.memory_space<vmem>>, vector<1x32xf32>,
    %c1_i32_80 = arith.constant 1 : i32
    %193 = arith.addi %185, %c1_i32_80 : i32
    %194 = arith.index_cast %193 : i32 to index
    %195 = memref.load %arg1[%194] : memref<32xi32, #tpu.memory_space<smem>>
    %196 = arith.index_cast %195 : i32 to index
    %c0_81 = arith.constant 0 : index
    %197 = vector.load %arg4[%196, %c0_81] : memref<24x32xf32, #tpu.memory_space<vmem>>, vector<1x32xf32>
    %198 = arith.index_cast %c6_i32 : i32 to index
    %c32_82 = arith.constant 32 : index
    %199 = vector.load %arg3[%198, %c32_82] : memref<8x128xf32, #tpu.memory_space<vmem>>, vector<1x32xf32>
    tpu.vector_store %arg3[%198, %c32_82], %197 {strides = array<i32>} : memref<8x128xf32, #tpu.memory_space<vmem>>, vector<1x32xf32>,
    %c2_i32_83 = arith.constant 2 : i32
    %200 = arith.addi %185, %c2_i32_83 : i32
    %201 = arith.index_cast %200 : i32 to index
    %202 = memref.load %arg1[%201] : memref<32xi32, #tpu.memory_space<smem>>
    %203 = arith.index_cast %202 : i32 to index
    %c0_84 = arith.constant 0 : index
    %204 = vector.load %arg4[%203, %c0_84] : memref<24x32xf32, #tpu.memory_space<vmem>>, vector<1x32xf32>
    %205 = arith.index_cast %c6_i32 : i32 to index
    %c64_85 = arith.constant 64 : index
    %206 = vector.load %arg3[%205, %c64_85] : memref<8x128xf32, #tpu.memory_space<vmem>>, vector<1x32xf32>
    tpu.vector_store %arg3[%205, %c64_85], %204 {strides = array<i32>} : memref<8x128xf32, #tpu.memory_space<vmem>>, vector<1x32xf32>,
    %c3_i32_86 = arith.constant 3 : i32
    %207 = arith.addi %185, %c3_i32_86 : i32
    %208 = arith.index_cast %207 : i32 to index
    %209 = memref.load %arg1[%208] : memref<32xi32, #tpu.memory_space<smem>>
    %210 = arith.index_cast %209 : i32 to index
    %c0_87 = arith.constant 0 : index
    %211 = vector.load %arg4[%210, %c0_87] : memref<24x32xf32, #tpu.memory_space<vmem>>, vector<1x32xf32>
    %212 = arith.index_cast %c6_i32 : i32 to index
    %c96_88 = arith.constant 96 : index
    %213 = vector.load %arg3[%212, %c96_88] : memref<8x128xf32, #tpu.memory_space<vmem>>, vector<1x32xf32>
    tpu.vector_store %arg3[%212, %c96_88], %211 {strides = array<i32>} : memref<8x128xf32, #tpu.memory_space<vmem>>, vector<1x32xf32>,
    %c7_i32 = arith.constant 7 : i32
    %c4_i32_89 = arith.constant 4 : i32
    %214 = arith.muli %c7_i32, %c4_i32_89 : i32
    %215 = arith.addi %3, %214 : i32
    %c0_i32_90 = arith.constant 0 : i32
    %216 = arith.addi %215, %c0_i32_90 : i32
    %217 = arith.index_cast %216 : i32 to index
    %218 = memref.load %arg1[%217] : memref<32xi32, #tpu.memory_space<smem>>
    %219 = arith.index_cast %218 : i32 to index
    %c0_91 = arith.constant 0 : index
    %220 = vector.load %arg4[%219, %c0_91] : memref<24x32xf32, #tpu.memory_space<vmem>>, vector<1x32xf32>
    %221 = arith.index_cast %c7_i32 : i32 to index
    %c0_92 = arith.constant 0 : index
    %222 = vector.load %arg3[%221, %c0_92] : memref<8x128xf32, #tpu.memory_space<vmem>>, vector<1x32xf32>
    tpu.vector_store %arg3[%221, %c0_92], %220 {strides = array<i32>} : memref<8x128xf32, #tpu.memory_space<vmem>>, vector<1x32xf32>,
    %c1_i32_93 = arith.constant 1 : i32
    %223 = arith.addi %215, %c1_i32_93 : i32
    %224 = arith.index_cast %223 : i32 to index
    %225 = memref.load %arg1[%224] : memref<32xi32, #tpu.memory_space<smem>>
    %226 = arith.index_cast %225 : i32 to index
    %c0_94 = arith.constant 0 : index
    %227 = vector.load %arg4[%226, %c0_94] : memref<24x32xf32, #tpu.memory_space<vmem>>, vector<1x32xf32>
    %228 = arith.index_cast %c7_i32 : i32 to index
    %c32_95 = arith.constant 32 : index
    %229 = vector.load %arg3[%228, %c32_95] : memref<8x128xf32, #tpu.memory_space<vmem>>, vector<1x32xf32>
    tpu.vector_store %arg3[%228, %c32_95], %227 {strides = array<i32>} : memref<8x128xf32, #tpu.memory_space<vmem>>, vector<1x32xf32>,
    %c2_i32_96 = arith.constant 2 : i32
    %230 = arith.addi %215, %c2_i32_96 : i32
    %231 = arith.index_cast %230 : i32 to index
    %232 = memref.load %arg1[%231] : memref<32xi32, #tpu.memory_space<smem>>
    %233 = arith.index_cast %232 : i32 to index
    %c0_97 = arith.constant 0 : index
    %234 = vector.load %arg4[%233, %c0_97] : memref<24x32xf32, #tpu.memory_space<vmem>>, vector<1x32xf32>
    %235 = arith.index_cast %c7_i32 : i32 to index
    %c64_98 = arith.constant 64 : index
    %236 = vector.load %arg3[%235, %c64_98] : memref<8x128xf32, #tpu.memory_space<vmem>>, vector<1x32xf32>
    tpu.vector_store %arg3[%235, %c64_98], %234 {strides = array<i32>} : memref<8x128xf32, #tpu.memory_space<vmem>>, vector<1x32xf32>,
    %c3_i32_99 = arith.constant 3 : i32
    %237 = arith.addi %215, %c3_i32_99 : i32
    %238 = arith.index_cast %237 : i32 to index
    %239 = memref.load %arg1[%238] : memref<32xi32, #tpu.memory_space<smem>>
    %240 = arith.index_cast %239 : i32 to index
    %c0_100 = arith.constant 0 : index
    %241 = vector.load %arg4[%240, %c0_100] : memref<24x32xf32, #tpu.memory_space<vmem>>, vector<1x32xf32>
    %242 = arith.index_cast %c7_i32 : i32 to index
    %c96_101 = arith.constant 96 : index
    %243 = vector.load %arg3[%242, %c96_101] : memref<8x128xf32, #tpu.memory_space<vmem>>, vector<1x32xf32>
    tpu.vector_store %arg3[%242, %c96_101], %241 {strides = array<i32>} : memref<8x128xf32, #tpu.memory_space<vmem>>, vector<1x32xf32>,
    %c8_i32 = arith.constant 8 : i32
    return
  }
  func.func @transform_1(%arg0: i32, %arg1: memref<32xi32, #tpu.memory_space<smem>>) -> (i32, i32) {
    %c0_i32 = arith.constant 0 : i32
    %c0_i32_0 = arith.constant 0 : i32
    return %arg0, %c0_i32 : i32, i32
  }
}

</mosaic_0001>

<bundles_post_ra>
// kernel: tpu_custom_call.1
= control target key start
LH: loop header
LB: loop body
LE: loop exit
PB: predicated region body
PF: predicated region fallthrough
CT: control target
= control target key end

     0   :  { %s434_s9 = smov [#allocation5]   ;;  %s566_s0 = inlined_call_operand.hbm [shape: s32[32], index: 0, kind: input, shape index: {}]   ;;  %s567_s1 = inlined_call_operand.hbm [shape: f32[24,32], index: 1, kind: input, shape index: {}]   ;;  %s568_s2 = inlined_call_operand.hbm [shape: f32[8,128], index: 2, kind: output, shape index: {}]  }
   0x1   :  { %8 = dma.hbm_to_smem %s566_s0, 16, %s434_s9, [#allocation4] }
   0x2   :  { %428 = dma.done.wait [#allocation4], 16 }
   0x3   :  { %429 = vsyncadd [#allocation4], 4294967280 }
   0x4   :  { %10 = sfence }
   0x5   :  { %11 = vsyncpa [#allocation7], 0  ;;  %s435_s12 = smov [#allocation2]  }
   0x6   :  { %s23_s13 = sshll.u32 %s435_s12, 4  ;;  %s24_s13 = int_to_ptr.vmem [resolvable:$true] %s23_s13 }
   0x7   :  { %s396_s14 = scalar_lea.vmem %s24_s13, 384  ;;  %p401_p1 = scmp.lt.s32.totalorder %s24_s13, %s24_s13 }
   0x8   :  { %p397_p0 = scmp.ne.s32.totalorder %s24_s13, %s396_s14  ;;  %p402_p2 = scmp.lt.s32.totalorder %s396_s14, %s396_s14 }
   0xa   :  { %p403_p3 = por %p402_p2, %p401_p1 }
   0xc   :  { %p404_p4 = pnand %p403_p3, %p397_p0 }
   0xe   :  { %407 = shalt.err (!%p404_p4)  }
   0xf   :  { %26 = dma.hbm_to_vmem [thread:$0]  %s567_s1, 384, %s24_s13, [#allocation3] }
  0x10   :  { %430 = dma.done.wait [#allocation3], 384 }
  0x11   :  { %431 = vsyncadd [#allocation3], 4294966912  ;;  %s350_s0 = sld [smem:[#allocation5 + $0x9]]  ;;  %s436_s25 = smov 32   ;;  %vm34_vm0 = vcmask 253952   ;;  %vm44_vm1 = vcmask 516352  }
  0x12   :  { %s342_s17 = sld [smem:[#allocation5 + $0x1]]  ;;  %vm54_vm2 = vcmask 778752   ;;  %vm64_vm3 = vcmask 1041152  }
  0x13   :  { %s354_s18 = sld [smem:[#allocation5 + $0xd]] }
  0x14   :  { %s346_s19 = sld [smem:[#allocation5 + $0x5]] }
  0x15   :  { %s362_s20 = sld [smem:[#allocation5 + $0x15]] }
  0x16   :  { %s358_s21 = sld [smem:[#allocation5 + $0x11]] }
  0x17   :  { %s370_s22 = sld [smem:[#allocation5 + $0x1d]]  ;;  %s105_s23 = scalar_lea.vmem [#allocation2], %s350_s0 }
  0x18   :  { %v106_v0 = vld [vmem:[%s105_s23] sm:$0x1]  ;;  %s366_s24 = sld [smem:[#allocation5 + $0x19]]  ;;  %s38_s26 = scalar_lea.vmem [#allocation2], %s342_s17 }
  0x19   :  { %108 = vrot.lane.b32.xlu1 %v106_v0, %s436_s25  ;;  %v39_v1 = vld [vmem:[%s38_s26] sm:$0x1]  ;;  %s137_s1 = scalar_lea.vmem [#allocation2], %s354_s18  ;;  %s347_s28 = sld [smem:[#allocation5 + $0x6]] }
  0x1a   :  { %41 = vrot.lane.b32.xlu0 %v39_v1, %s436_s25  ;;  %v138_v2 = vld [vmem:[%s137_s1] sm:$0x1]  ;;  %s73_s27 = scalar_lea.vmem [#allocation2], %s346_s19  ;;  %s343_s29 = sld [smem:[#allocation5 + $0x2]] }
  0x1b   :  { %v74_v3 = vld [vmem:[%s73_s27] sm:$0x1]  ;;  %s201_s30 = scalar_lea.vmem [#allocation2], %s362_s20  ;;  %s465_s3 = sld [smem:[#allocation5 + $0xe]] }
  0x1c   :  { %v202_v4 = vld [vmem:[%s201_s30] sm:$0x1]  ;;  %s169_s4 = scalar_lea.vmem [#allocation2], %s358_s21  ;;  %s467_s5 = sld [smem:[#allocation5 + $0xa]] }
  0x1d   :  { %140 = vrot.lane.b32.xlu1 %v138_v2, %s436_s25  ;;  %v170_v5 = vld [vmem:[%s169_s4] sm:$0x1]  ;;  %s469_s6 = sld [smem:[#allocation5 + $0x16]]  ;;  %s265_s8 = scalar_lea.vmem [#allocation2], %s370_s22 }
  0x1e   :  { %76 = vrot.lane.b32.xlu0 %v74_v3, %s436_s25  ;;  %s472_s7 = sld [smem:[#allocation5 + $0x12]]  ;;  %v266_v6 = vld [vmem:[%s265_s8] sm:$0x1]  ;;  %s233_s10 = scalar_lea.vmem [#allocation2], %s366_s24 }
  0x1f   :  { %s475_s9 = sld [smem:[#allocation5 + $0x1e]]  ;;  %v234_v7 = vld [vmem:[%s233_s10] sm:$0x1]  ;;  %s82_s14 = scalar_lea.vmem [#allocation2], %s347_s28 }
  0x20   :  { %s477_s11 = sld [smem:[#allocation5 + $0x1a]]  ;;  %v83_v8 = vld [vmem:[%s82_s14] sm:$0x1]  ;;  %s48_s16 = scalar_lea.vmem [#allocation2], %s343_s29 }
  0x21   :  { %204 = vrot.lane.b32.xlu1 %v202_v4, %s436_s25  ;;  %s479_s12 = sld [smem:[#allocation5 + $0x7]]  ;;  %v49_v9 = vld [vmem:[%s48_s16] sm:$0x1]  ;;  %s437_s18 = smov 64  }
  0x22   :  { %172 = vrot.lane.b32.xlu0 %v170_v5, %s436_s25  ;;  %s482_s13 = sld [smem:[#allocation5 + $0x3]]  ;;  %s146_s20 = scalar_lea.vmem [#allocation2], %s465_s3 }
  0x23   :  { %s485_s15 = sld [smem:[#allocation5 + $0xf]]  ;;  %v147_v10 = vld [vmem:[%s146_s20] sm:$0x1]  ;;  %s114_s22 = scalar_lea.vmem [#allocation2], %s467_s5 }
  0x24   :  { %s487_s0 = sld [smem:[#allocation5 + $0xb]]  ;;  %v115_v11 = vld [vmem:[%s114_s22] sm:$0x1]  ;;  %s210_s26 = scalar_lea.vmem [#allocation2], %s469_s6 }
  0x25   :  { %268 = vrot.lane.b32.xlu1 %v266_v6, %s436_s25  ;;  %s489_s17 = sld [smem:[#allocation5 + $0x17]]  ;;  %v211_v12 = vld [vmem:[%s210_s26] sm:$0x1]  ;;  %s178_s27 = scalar_lea.vmem [#allocation2], %s472_s7 }
  0x26   :  { %236 = vrot.lane.b32.xlu0 %v234_v7, %s436_s25  ;;  %s349_s19 = sld [smem:[#allocation5 + $0x8]]  ;;  %v179_v13 = vld [vmem:[%s178_s27] sm:$0x1]  ;;  %s274_s3 = scalar_lea.vmem [#allocation2], %s475_s9 }
  0x27   :  { %s31_s21 = sld [smem:[#allocation5]]  ;;  %v275_v15 = vld [vmem:[%s274_s3] sm:$0x1]  ;;  %s242_s7 = scalar_lea.vmem [#allocation2], %s477_s11 }
  0x28   :  { %s353_s23 = sld [smem:[#allocation5 + $0xc]]  ;;  %v243_v18 = vld [vmem:[%s242_s7] sm:$0x1]  ;;  %s91_s11 = scalar_lea.vmem [#allocation2], %s479_s12 }
  0x29   :  { %85 = vrot.lane.b32.xlu1 %v83_v8, %s437_s18  ;;  %s495_s24 = sld [smem:[#allocation5 + $0x4]]  ;;  %v92_v22 = vld [vmem:[%s91_s11] sm:$0x1]  ;;  %s155_s12 = scalar_lea.vmem [#allocation2], %s485_s15 }
  0x2a   :  { %51 = vrot.lane.b32.xlu0 %v49_v9, %s437_s18  ;;  %s498_s25 = sld [smem:[#allocation5 + $0x14]]  ;;  %v156_v26 = vld [vmem:[%s155_s12] sm:$0x1]  ;;  %s123_s22 = scalar_lea.vmem [#allocation2], %s487_s0 }
  0x2b   :  { %s502_s1 = sld [smem:[#allocation5 + $0x10]]  ;;  %v124_v27 = vld [vmem:[%s123_s22] sm:$0x1]  ;;  %s439_s15 = smov [#allocation6]  }
  0x2c   :  { %s505_s28 = sld [smem:[#allocation5 + $0x1c]]  ;;  %s100_s29 = scalar_lea.vmem [#allocation2], %s349_s19 }
  0x2d   :  { %149 = vrot.lane.b32.xlu1 %v147_v10, %s437_s18  ;;  %v101_v14 = vld [vmem:[%s100_s29] sm:$0x1]  ;;  %s507_s30 = sld [smem:[#allocation5 + $0x18]]  ;;  %s32_s4 = scalar_lea.vmem [#allocation2], %s31_s21 }
  0x2e   :  { %117 = vrot.lane.b32.xlu0 %v115_v11, %s437_s18  ;;  %102 = vst.msk [vmem:[#allocation6 + $0x2] sm:$0x1] %vm34_vm0, %v101_v14  ;;  %v33_v16 = vld [vmem:[%s32_s4] sm:$0x1]  ;;  %s513_s5 = sld [smem:[#allocation5 + $0x13]]  ;;  %s132_s6 = scalar_lea.vmem [#allocation2], %s353_s23 }
  0x2f   :  { %35 = vst.msk [vmem:[#allocation6] sm:$0x1] %vm34_vm0, %v33_v16  ;;  %v133_v17 = vld [vmem:[%s132_s6] sm:$0x1]  ;;  %s68_s8 = scalar_lea.vmem [#allocation2], %s495_s24  ;;  %s522_s10 = sld [smem:[#allocation5 + $0x1f]] }
  0x30   :  { %134 = vst.msk [vmem:[#allocation6 + $0x3] sm:$0x1] %vm34_vm0, %v133_v17  ;;  %v69_v19 = vld [vmem:[%s68_s8] sm:$0x1]  ;;  %s196_s9 = scalar_lea.vmem [#allocation2], %s498_s25  ;;  %s58_s19 = scalar_lea.vmem [#allocation2], %s482_s13 }
  0x31   :  { %213 = vrot.lane.b32.xlu1 %v211_v12, %s437_s18  ;;  %70 = vst.msk [vmem:[#allocation6 + $0x1] sm:$0x1] %vm34_vm0, %v69_v19  ;;  %v197_v20 = vld [vmem:[%s196_s9] sm:$0x1]  ;;  %s164_s14 = scalar_lea.vmem [#allocation2], %s502_s1  ;;  %s368_s21 = sld [smem:[#allocation5 + $0x1b]] }
  0x32   :  { %181 = vrot.lane.b32.xlu0 %v179_v13, %s437_s18  ;;  %198 = vst.msk [vmem:[#allocation6 + $0x5] sm:$0x1] %vm34_vm0, %v197_v20  ;;  %v165_v21 = vld [vmem:[%s164_s14] sm:$0x1]  ;;  %s260_s16 = scalar_lea.vmem [#allocation2], %s505_s28  ;;  %s219_s13 = scalar_lea.vmem [#allocation2], %s489_s17 }
  0x33   :  { %166 = vst.msk [vmem:[#allocation6 + $0x4] sm:$0x1] %vm34_vm0, %v165_v21  ;;  %v261_v23 = vld [vmem:[%s260_s16] sm:$0x1]  ;;  %s228_s20 = scalar_lea.vmem [#allocation2], %s507_s30  ;;  %s296_s0 = sshll.u32 %s439_s15, 4  ;;  %s297_s0 = int_to_ptr.vmem [resolvable:$true] %s296_s0 }
  0x34   :  { %v59_v24 = vld [vmem:[%s58_s19] sm:$0x1]  ;;  %262 = vst.msk [vmem:[#allocation6 + $0x7] sm:$0x1] %vm34_vm0, %v261_v23  ;;  %s187_s23 = scalar_lea.vmem [#allocation2], %s513_s5  ;;  %s408_s17 = scalar_lea.vmem %s297_s0, 128 }
  0x35   :  { %277 = vrot.lane.b32.xlu1 %v275_v15, %s437_s18  ;;  %v229_v25 = vld [vmem:[%s228_s20] sm:$0x1]  ;;  %s283_s24 = scalar_lea.vmem [#allocation2], %s522_s10  ;;  %p409_p5 = scmp.ne.s32.totalorder %s297_s0, %s408_s17 }
  0x36   :  { %245 = vrot.lane.b32.xlu0 %v243_v18, %s437_s18  ;;  %230 = vst.msk [vmem:[#allocation6 + $0x6] sm:$0x1] %vm34_vm0, %v229_v25  ;;  %s438_s18 = smov 96   ;;  %v220_v28 = vld [vmem:[%s219_s13] sm:$0x1]  ;;  %p413_p6 = scmp.lt.s32.totalorder %s297_s0, %s297_s0 }
  0x37   :  { %v188_v29 = vld [vmem:[%s187_s23] sm:$0x1]  ;;  %s251_s25 = scalar_lea.vmem [#allocation2], %s368_s21  ;;  %p414_p7 = scmp.lt.s32.totalorder %s408_s17, %s408_s17 }
  0x38   :  { %v284_v30 = vld [vmem:[%s283_s24] sm:$0x1] }
  0x39   :  { %94 = vrot.lane.b32.xlu1 %v92_v22, %s438_s18  ;;  %v252_v31 = vld [vmem:[%s251_s25] sm:$0x1]  ;;  %p415_p8 = por %p414_p7, %p413_p6 }
  0x3a   :  { %61 = vrot.lane.b32.xlu0 %v59_v24, %s438_s18 }
  0x3b   :  { %p416_p9 = pnand %p415_p8, %p409_p5 }
  0x3d   :  { %158 = vrot.lane.b32.xlu1 %v156_v26, %s438_s18 }
  0x3e   :  { %126 = vrot.lane.b32.xlu0 %v124_v27, %s438_s18 }
  0x41   :  { %222 = vrot.lane.b32.xlu1 %v220_v28, %s438_s18 }
  0x42   :  { %190 = vrot.lane.b32.xlu0 %v188_v29, %s438_s18 }
  0x45   :  { %286 = vrot.lane.b32.xlu1 %v284_v30, %s438_s18 }
  0x46   :  { %254 = vrot.lane.b32.xlu0 %v252_v31, %s438_s18 }
  0x8b   :  { %v109_v32 = vpop.permute.xlu1 %108 }
  0x8c   :  { %111 = vst.msk [vmem:[#allocation6 + $0x2] sm:$0x1] %vm44_vm1, %v109_v32  ;;  %v42_v33 = vpop.permute.xlu0 %41 }
  0x8d   :  { %45 = vst.msk [vmem:[#allocation6] sm:$0x1] %vm44_vm1, %v42_v33 }
  0x8f   :  { %v141_v34 = vpop.permute.xlu1 %140 }
  0x90   :  { %143 = vst.msk [vmem:[#allocation6 + $0x3] sm:$0x1] %vm44_vm1, %v141_v34  ;;  %v77_v35 = vpop.permute.xlu0 %76 }
  0x91   :  { %79 = vst.msk [vmem:[#allocation6 + $0x1] sm:$0x1] %vm44_vm1, %v77_v35 }
  0x93   :  { %v205_v36 = vpop.permute.xlu1 %204 }
  0x94   :  { %207 = vst.msk [vmem:[#allocation6 + $0x5] sm:$0x1] %vm44_vm1, %v205_v36  ;;  %v173_v37 = vpop.permute.xlu0 %172 }
  0x95   :  { %175 = vst.msk [vmem:[#allocation6 + $0x4] sm:$0x1] %vm44_vm1, %v173_v37 }
  0x97   :  { %v269_v38 = vpop.permute.xlu1 %268 }
  0x98   :  { %271 = vst.msk [vmem:[#allocation6 + $0x7] sm:$0x1] %vm44_vm1, %v269_v38  ;;  %v237_v39 = vpop.permute.xlu0 %236 }
  0x99   :  { %239 = vst.msk [vmem:[#allocation6 + $0x6] sm:$0x1] %vm44_vm1, %v237_v39 }
  0x9b   :  { %v86_v40 = vpop.permute.xlu1 %85 }
  0x9c   :  { %88 = vst.msk [vmem:[#allocation6 + $0x1] sm:$0x1] %vm54_vm2, %v86_v40  ;;  %v52_v41 = vpop.permute.xlu0 %51 }
  0x9d   :  { %55 = vst.msk [vmem:[#allocation6] sm:$0x1] %vm54_vm2, %v52_v41 }
  0x9f   :  { %v150_v42 = vpop.permute.xlu1 %149 }
  0xa0   :  { %152 = vst.msk [vmem:[#allocation6 + $0x3] sm:$0x1] %vm54_vm2, %v150_v42  ;;  %v118_v43 = vpop.permute.xlu0 %117 }
  0xa1   :  { %120 = vst.msk [vmem:[#allocation6 + $0x2] sm:$0x1] %vm54_vm2, %v118_v43 }
  0xa3   :  { %v214_v44 = vpop.permute.xlu1 %213 }
  0xa4   :  { %216 = vst.msk [vmem:[#allocation6 + $0x5] sm:$0x1] %vm54_vm2, %v214_v44  ;;  %v182_v45 = vpop.permute.xlu0 %181 }
  0xa5   :  { %184 = vst.msk [vmem:[#allocation6 + $0x4] sm:$0x1] %vm54_vm2, %v182_v45 }
  0xa7   :  { %v278_v46 = vpop.permute.xlu1 %277 }
  0xa8   :  { %280 = vst.msk [vmem:[#allocation6 + $0x7] sm:$0x1] %vm54_vm2, %v278_v46  ;;  %v246_v47 = vpop.permute.xlu0 %245 }
  0xa9   :  { %248 = vst.msk [vmem:[#allocation6 + $0x6] sm:$0x1] %vm54_vm2, %v246_v47 }
  0xab   :  { %v95_v48 = vpop.permute.xlu1 %94 }
  0xac   :  { %97 = vst.msk [vmem:[#allocation6 + $0x1] sm:$0x1] %vm64_vm3, %v95_v48  ;;  %v62_v49 = vpop.permute.xlu0 %61 }
  0xad   :  { %65 = vst.msk [vmem:[#allocation6] sm:$0x1] %vm64_vm3, %v62_v49 }
  0xaf   :  { %v159_v50 = vpop.permute.xlu1 %158 }
  0xb0   :  { %161 = vst.msk [vmem:[#allocation6 + $0x3] sm:$0x1] %vm64_vm3, %v159_v50  ;;  %v127_v51 = vpop.permute.xlu0 %126 }
  0xb1   :  { %129 = vst.msk [vmem:[#allocation6 + $0x2] sm:$0x1] %vm64_vm3, %v127_v51 }
  0xb3   :  { %v223_v52 = vpop.permute.xlu1 %222 }
  0xb4   :  { %225 = vst.msk [vmem:[#allocation6 + $0x5] sm:$0x1] %vm64_vm3, %v223_v52  ;;  %v191_v53 = vpop.permute.xlu0 %190 }
  0xb5   :  { %193 = vst.msk [vmem:[#allocation6 + $0x4] sm:$0x1] %vm64_vm3, %v191_v53 }
  0xb7   :  { %v287_v54 = vpop.permute.xlu1 %286 }
  0xb8   :  { %289 = vst.msk [vmem:[#allocation6 + $0x7] sm:$0x1] %vm64_vm3, %v287_v54  ;;  %v255_v55 = vpop.permute.xlu0 %254 }
  0xb9   :  { %257 = vst.msk [vmem:[#allocation6 + $0x6] sm:$0x1] %vm64_vm3, %v255_v55 }
  0xba   :  { %419 = shalt.err (!%p416_p9)
}
  0xbb   :  { %299 = dma.vmem_to_hbm [thread:$0]  %s297_s0, 128, %s568_s2, [#allocation7]  }
  0xbc   :  { %432 = dma.done.wait [#allocation7], 128  }
  0xbd   :  { %433 = vsyncadd [#allocation7], 4294967168 }
  0xbe   :  { %303 = vsyncpa [#allocation7], 1 }
  0xbf   :  { %304 = vsyncmov [#allocation3] }
  0xc2   :  { %s305_s27 = vpop.sfrf %304 }
  0xc3   :  { %p373_p10 = scmp.ne.s32.totalorder %s305_s27, 0 }
  0xc5   :  { %309 = shalt.err (%p373_p10)  }

</bundles_post_ra>
